<compile_context>
chip_gen: v5e
topology: v5e:2x2
jax: 0.10.0
libtpu: 0.0.40
codegen_flags: <defaults>
</compile_context>

<pallas_src>
from typing import NamedTuple

import jax
import jax.numpy as jnp
from jax.experimental import pallas as pl
from jax.experimental.pallas import tpu as pltpu


class HyenaYParams(NamedTuple):
    w_fused: jax.Array   # [D, n_dc*2*TD]  per channel block: [Wu^T blk | Wv^T blk]
    b_fused: jax.Array   # [1, n_dc*2*TD]  per channel block: [bu blk | bv blk]
    f_kd: jax.Array      # [K, D]          filter[d, 0, k] -> f_kd[k, d]
    dim: int
    filter_len: int
    d_block: int


def _round_up(x, m):
    return -(-x // m) * m


def _pick_d_block(dim, compute_itemsize, max_weight_block_bytes=4 << 20):
    """Largest multiple-of-128 divisor of dim keeping the fused weight block
    [dim, 2*TD] under ~4 MiB (so double-buffered weights fit v7x VMEM)."""
    best, td = 128, 128
    while td <= dim:
        if dim % td == 0 and dim * 2 * td * compute_itemsize <= max_weight_block_bytes:
            best = td
        td += 128
    return best


def prepare_hyena_params(wu, bu, wv, bv, filt, *, d_block=None,
                         compute_dtype=jnp.bfloat16):
    """Precompute fused / channel-blocked parameter layouts ONCE (hoisted out
    of the per-call forward path).  wu/wv are nn.Linear weights [out, in]."""
    dim = wu.shape[0]
    k_len = filt.shape[-1]
    assert wu.shape == (dim, dim) and wv.shape == (dim, dim)
    assert dim % 128 == 0, "hidden dim must be lane-aligned (multiple of 128)"
    itemsize = jnp.dtype(compute_dtype).itemsize
    td = d_block if d_block is not None else _pick_d_block(dim, itemsize)
    assert dim % td == 0 and td % 128 == 0
    n_dc = dim // td

    wu_t = wu.T.reshape(dim, n_dc, td)            # [in, out] blocked over out
    wv_t = wv.T.reshape(dim, n_dc, td)
    w_fused = jnp.stack([wu_t, wv_t], axis=2).reshape(dim, n_dc * 2 * td)
    b_fused = jnp.stack([bu.reshape(n_dc, td), bv.reshape(n_dc, td)],
                        axis=1).reshape(1, n_dc * 2 * td)
    f_kd = jnp.transpose(filt[:, 0, :], (1, 0))   # [K, D]
    return HyenaYParams(w_fused.astype(compute_dtype),
                        b_fused.astype(jnp.float32),
                        f_kd.astype(jnp.float32),
                        dim, k_len, td)


def _hyena_y_kernel(x_ref, w_ref, b_ref, f_ref, o_ref, carry_ref):
    """One (batch-block, channel-block, sequence-tile) grid step.

    x_ref     : [TB, TL, D]    input block (f32 or bf16)
    w_ref     : [D, 2*TD]      fused [Wu^T | Wv^T] columns of this channel block
    b_ref     : [1, 2*TD]      fused [bu | bv] of this channel block (f32)
    f_ref     : [K, TD]        depthwise filter taps of this channel block (f32)
    o_ref     : [TB, TL, TD]   output block
    carry_ref : [TB, C, TD]    f32 scratch: last C u rows of the previous tile
    """
    tb, tl, d = x_ref.shape
    k_len, td = f_ref.shape
    c = carry_ref.shape[1]
    l = pl.program_id(2)

    # First sequence tile of each (batch, channel) sweep: causal zero padding.
    @pl.when(l == 0)
    def _():
        carry_ref[...] = jnp.zeros_like(carry_ref)

    # Fused u/v projection: one [TB*TL, D] x [D, 2*TD] MXU matmul, bf16 inputs
    # (no-op cast if x is already bf16), f32 accumulation, f32 bias add.
    x2 = x_ref[...].reshape(tb * tl, d).astype(w_ref.dtype)
    uv = jnp.dot(x2, w_ref[...], preferred_element_type=jnp.float32) + b_ref[...]

    f = f_ref[...]                               # [K, TD], hoisted out of tap loop

    # Depthwise causal conv + gate, one folded batch element at a time so all
    # sequence-axis shifts are plain 2-D sublane slices of a value (no
    # full-tile round trip through VMEM scratch; only the C-row carry persists).
    for i in range(tb):                          # TB is small & static -> unrolled
        u = uv[i * tl:(i + 1) * tl, :td]         # [TL, TD] f32
        v = uv[i * tl:(i + 1) * tl, td:]         # [TL, TD] f32
        acc = u * f[k_len - 1]                   # last tap needs no shift
        if k_len > 1:
            ext = jnp.concatenate([carry_ref[i], u], axis=0)   # [C+TL, TD]
            for k in range(k_len - 1):           # K small & static -> unrolled
                start = c - (k_len - 1) + k
                acc = acc + ext[start:start + tl, :] * f[k]
        # Save the last C u rows as causal history for the next sequence tile.
        carry_ref[i] = u[tl - c:, :]
        # Hyena-Y gate (no conv on the v branch); dropout p=0 -> identity.
        o_ref[i] = (acc * v).astype(o_ref.dtype)


def _derive_vmem_limit_bytes():
    """Per-generation scoped-VMEM limit: ~half of physical VMEM
    (v5e/v6e: 64 MiB, v7x: 32 MiB, conservative 32 MiB fallback)."""
    cap = None
    try:
        cap = getattr(pltpu.get_tpu_info(), "vmem_capacity_bytes", None)
    except Exception:
        cap = None
    if not cap:
        cap = 64 * 1024 * 1024
    return max(32 * 1024 * 1024, int(cap) // 2)


def hyena_y_forward(x, params: HyenaYParams, *, causal=True,
                    max_seq_tile=4096, out_dtype=None):
    """x: [B, L, D].  Returns [B, L, D] in out_dtype (default x.dtype).
    Feeding bf16 x / requesting bf16 output halves HBM traffic (the matmul
    path is bf16-in / f32-accumulate either way)."""
    assert causal, "only the causal variant (module default) is implemented"
    B, L, D = x.shape
    assert D == params.dim
    K, TD = params.filter_len, params.d_block
    n_dc = D // TD
    # TODO(synk): the PyTorch branch for short_filter_length > seq_len (filter
    # truncation with unchanged padding) is not reproduced here; require K <= L.
    assert K <= L
    out_dtype = x.dtype if out_dtype is None else out_dtype

    # Causal history rows carried across sequence tiles (sublane aligned, >= K-1).
    C = max(8, _round_up(K - 1, 8))

    # --- sequence tiling: big tiles (amortize per-step overhead, reach the HBM
    # roofline), shrunk only if the per-step VMEM estimate would not fit. ---
    vmem_limit = _derive_vmem_limit_bytes()
    x_bytes = jnp.dtype(x.dtype).itemsize
    o_bytes = jnp.dtype(out_dtype).itemsize
    w_block_bytes = 2 * D * 2 * TD * params.w_fused.dtype.itemsize  # double buffered
    # rough per-row VMEM: double-buffered in/out blocks + bf16 cast + f32 temps
    bytes_per_row = 2 * D * x_bytes + 2 * TD * o_bytes + 2 * D + 8 * TD * 4
    budget = max(int(0.8 * (vmem_limit - w_block_bytes)), 2 << 20)
    n_tiles = max(1, -(-L // max_seq_tile))
    while True:
        TL = max(C, _round_up(-(-L // n_tiles), 8))
        if TL * bytes_per_row <= budget or TL <= max(C, 128):
            break
        n_tiles += 1
    n_l = -(-L // TL)
    L_pad = n_l * TL

    # --- fold batch elements while blocks are small (< ~1-2 MB / operand) so
    # per-grid-step overhead stays amortized; conv unrolls per folded batch. ---
    TB = 1
    if TL * D * x_bytes < (1 << 20):
        for cand in range(min(B, 16), 0, -1):
            if (B % cand == 0 and cand * TL * D * x_bytes <= (2 << 20)
                    and cand * TL * bytes_per_row <= budget):
                TB = cand
                break

    if L_pad != L:
        # Padded rows sit at the causal tail: they never affect real outputs.
        x = jnp.pad(x, ((0, 0), (0, L_pad - L), (0, 0)))

    grid = (B // TB, n_dc, n_l)

    flops = 2 * B * L_pad * D * 2 * D + B * L_pad * D * (2 * K + 1)
    bytes_accessed = (n_dc * B * L_pad * D * x_bytes
                      + int(params.w_fused.size) * params.w_fused.dtype.itemsize
                      + int(params.b_fused.size) * 4 + int(params.f_kd.size) * 4
                      + B * L_pad * D * o_bytes)
    cost = pl.CostEstimate(flops=int(flops), transcendentals=0,
                           bytes_accessed=int(bytes_accessed))

    # NOTE: the constant w/b/f blocks would ideally be single-buffered
    # (pipeline_mode=pl.Buffered(1)); channel blocking already caps their VMEM.
    out = pl.pallas_call(
        _hyena_y_kernel,
        out_shape=jax.ShapeDtypeStruct((B, L_pad, D), out_dtype),
        grid=grid,
        in_specs=[
            pl.BlockSpec((TB, TL, D), lambda b, dc, l: (b, l, 0)),    # x
            pl.BlockSpec((D, 2 * TD), lambda b, dc, l: (0, dc)),      # [Wu^T | Wv^T]
            pl.BlockSpec((1, 2 * TD), lambda b, dc, l: (0, dc)),      # [bu | bv]
            pl.BlockSpec((K, TD), lambda b, dc, l: (0, dc)),          # filter
        ],
        out_specs=pl.BlockSpec((TB, TL, TD), lambda b, dc, l: (b, l, dc)),
        scratch_shapes=[pltpu.VMEM((TB, C, TD), jnp.float32)],
        compiler_params=pltpu.CompilerParams(
            dimension_semantics=("parallel", "parallel", "arbitrary"),
            vmem_limit_bytes=vmem_limit),
        cost_estimate=cost,
    )(x, params.w_fused, params.b_fused, params.f_kd)

    return out if L_pad == L else out[:, :L, :]


def _reference(x, wu, bu, wv, bv, filt):
    """Pure-JAX reference mirroring the PyTorch forward (dropout=0), with the
    same bf16-input / f32-accumulation matmul numerics as the kernel."""
    B, L, D = x.shape
    K = filt.shape[-1]
    xb = x.astype(jnp.bfloat16)
    u = jnp.dot(xb, wu.T.astype(jnp.bfloat16),
                preferred_element_type=jnp.float32) + bu
    v = jnp.dot(xb, wv.T.astype(jnp.bfloat16),
                preferred_element_type=jnp.float32) + bv
    u_pad = jnp.pad(u, ((0, 0), (K - 1, 0), (0, 0)))    # causal left pad on L
    f_kd = jnp.transpose(filt[:, 0, :], (1, 0))          # [K, D]
    uf = jnp.zeros_like(u)
    for k in range(K):
        uf = uf + u_pad[:, k:k + L, :] * f_kd[k][None, None, :]
    return (uf * v).astype(x.dtype)


def _make_inputs(key, B, L, D, K):
    k1, k2, k3, k4, k5, k6 = jax.random.split(key, 6)
    x = jax.random.normal(k1, (B, L, D), dtype=jnp.float32)
    wu = jax.random.normal(k2, (D, D), dtype=jnp.float32) * 0.05
    bu = jax.random.normal(k3, (D,), dtype=jnp.float32) * 0.05
    wv = jax.random.normal(k4, (D, D), dtype=jnp.float32) * 0.05
    bv = jax.random.normal(k5, (D,), dtype=jnp.float32) * 0.05
    filt = jax.random.normal(k6, (D, 1, K), dtype=jnp.float32)
    return x, wu, bu, wv, bv, filt


if __name__ == "__main__":
    key = jax.random.PRNGKey(0)
    key1, key2 = jax.random.split(key, 2)

    # --- test 1: B=2, L=64, D=128, K=4 (single sequence tile, batch folding) ---
    B, L, D, K = 2, 64, 128, 4
    x, wu, bu, wv, bv, filt = _make_inputs(key1, B, L, D, K)
    params = prepare_hyena_params(wu, bu, wv, bv, filt)
    y = jax.block_until_ready(hyena_y_forward(x, params))
    y_ref = _reference(x, wu, bu, wv, bv, filt)
    assert y.shape == (B, L, D)
    assert jnp.allclose(y, y_ref, atol=2e-2, rtol=2e-2), "mismatch (test 1)"

    # --- test 2: B=1, L=70 (padded to a tile multiple), D=256 split into two
    # channel blocks, K=5, forced small sequence tile -> exercises the causal
    # carry across tiles, the channel-block grid axis, and remainder padding. ---
    B, L, D, K = 1, 70, 256, 5
    x, wu, bu, wv, bv, filt = _make_inputs(key2, B, L, D, K)
    params2 = prepare_hyena_params(wu, bu, wv, bv, filt, d_block=128)
    y2 = jax.block_until_ready(hyena_y_forward(x, params2, max_seq_tile=24))
    y2_ref = _reference(x, wu, bu, wv, bv, filt)
    assert y2.shape == (B, L, D)
    assert jnp.allclose(y2, y2_ref, atol=2e-2, rtol=2e-2), "mismatch (test 2)"

    print("KERNEL_OK")
</pallas_src>

<mosaic_0001>
module attributes {stable_mosaic.version = 11 : i64} {
  func.func @_hyena_y_kernel(%arg0: i32, %arg1: i32, %arg2: i32, %arg3: memref<2x64x128xf32, #tpu.memory_space<vmem>>, %arg4: memref<128x256xbf16, #tpu.memory_space<vmem>>, %arg5: memref<1x256xf32, #tpu.memory_space<vmem>>, %arg6: memref<4x128xf32, #tpu.memory_space<vmem>>, %arg7: memref<2x64x128xf32, #tpu.memory_space<vmem>>, %arg8: memref<2x8x128xf32, #tpu.memory_space<vmem>>) attributes {dimension_semantics = [#tpu.dimension_semantics<parallel>, #tpu.dimension_semantics<parallel>, #tpu.dimension_semantics<arbitrary>], iteration_bounds = array<i64: 1, 1, 1>, scalar_prefetch = 0 : i64, scratch_operands = 1 : i64, tpu.core_type = #tpu.core_type<tc>, window_params = [{transform_indices = @transform_0, window_bounds = array<i64: 2, 64, 128>}, {transform_indices = @transform_1, window_bounds = array<i64: 128, 256>}, {transform_indices = @transform_2, window_bounds = array<i64: 1, 256>}, {transform_indices = @transform_3, window_bounds = array<i64: 4, 128>}, {transform_indices = @transform_4, window_bounds = array<i64: 2, 64, 128>}]} {
    %c0_i32 = arith.constant 0 : i32
    %0 = arith.cmpi eq, %arg2, %c0_i32 : i32
    %1 = arith.extui %0 : i1 to i32
    %c0_i32_0 = arith.constant 0 : i32
    %2 = arith.cmpi ne, %1, %c0_i32_0 : i32
    scf.if %2 {
      %cst_26 = arith.constant 0.000000e+00 : f32
      %90 = vector.broadcast %cst_26 : f32 to vector<2x8x128xf32>
      %c0_27 = arith.constant 0 : index
      %c0_28 = arith.constant 0 : index
      %c0_29 = arith.constant 0 : index
      %91 = vector.load %arg8[%c0_27, %c0_28, %c0_29] : memref<2x8x128xf32, #tpu.memory_space<vmem>>, vector<2x8x128xf32>
      tpu.vector_store %arg8[%c0_27, %c0_28, %c0_29], %90 {strides = array<i32>} : memref<2x8x128xf32, #tpu.memory_space<vmem>>, vector<2x8x128xf32>,
    } else {
    }
    %c0 = arith.constant 0 : index
    %c0_1 = arith.constant 0 : index
    %c0_2 = arith.constant 0 : index
    %3 = vector.load %arg3[%c0, %c0_1, %c0_2] : memref<2x64x128xf32, #tpu.memory_space<vmem>>, vector<2x64x128xf32>
    %4 = vector.shape_cast %3 : vector<2x64x128xf32> to vector<128x128xf32>
    %5 = arith.truncf %4 : vector<128x128xf32> to vector<128x128xbf16>
    %c0_3 = arith.constant 0 : index
    %c0_4 = arith.constant 0 : index
    %6 = vector.load %arg4[%c0_3, %c0_4] : memref<128x256xbf16, #tpu.memory_space<vmem>>, vector<128x256xbf16>
    %cst = arith.constant dense<0.000000e+00> : vector<128x256xf32>
    %7 = tpu.matmul %5, %6, %cst {dimension_numbers = #tpu.dot_dimension_numbers<[1], [0], [0], [1], [0, 0, 1, 1], [], []>} : vector<128x128xbf16>, vector<128x256xbf16>, vector<128x256xf32> -> vector<128x256xf32>
    %c0_5 = arith.constant 0 : index
    %c0_6 = arith.constant 0 : index
    %8 = vector.load %arg5[%c0_5, %c0_6] : memref<1x256xf32, #tpu.memory_space<vmem>>, vector<1x256xf32>
    %9 = vector.broadcast %8 : vector<1x256xf32> to vector<128x256xf32>
    %10 = arith.addf %7, %9 : vector<128x256xf32>
    %c0_7 = arith.constant 0 : index
    %c0_8 = arith.constant 0 : index
    %11 = vector.load %arg6[%c0_7, %c0_8] : memref<4x128xf32, #tpu.memory_space<vmem>>, vector<4x128xf32>
    %12 = vector.extract_strided_slice %10 {offsets = [0, 0], sizes = [64, 128], strides = [1, 1]} : vector<128x256xf32> to vector<64x128xf32>
    %13 = vector.extract_strided_slice %10 {offsets = [0, 128], sizes = [64, 128], strides = [1, 1]} : vector<128x256xf32> to vector<64x128xf32>
    %14 = vector.extract_strided_slice %11 {offsets = [3, 0], sizes = [1, 128], strides = [1, 1]} : vector<4x128xf32> to vector<1x128xf32>
    %15 = vector.shape_cast %14 : vector<1x128xf32> to vector<128xf32>
    %16 = vector.shape_cast %15 : vector<128xf32> to vector<1x128xf32>
    %17 = vector.broadcast %16 : vector<1x128xf32> to vector<64x128xf32>
    %18 = arith.mulf %12, %17 : vector<64x128xf32>
    %c0_9 = arith.constant 0 : index
    %c0_10 = arith.constant 0 : index
    %c0_11 = arith.constant 0 : index
    %19 = vector.load %arg8[%c0_9, %c0_10, %c0_11] : memref<2x8x128xf32, #tpu.memory_space<vmem>>, vector<1x8x128xf32>
    %20 = vector.shape_cast %19 : vector<1x8x128xf32> to vector<8x128xf32>
    %21 = tpu.concatenate %20, %12 in 0 : vector<8x128xf32>, vector<64x128xf32> -> vector<72x128xf32>
    %22 = vector.extract_strided_slice %21 {offsets = [5, 0], sizes = [64, 128], strides = [1, 1]} : vector<72x128xf32> to vector<64x128xf32>
    %23 = vector.extract_strided_slice %11 {offsets = [0, 0], sizes = [1, 128], strides = [1, 1]} : vector<4x128xf32> to vector<1x128xf32>
    %24 = vector.shape_cast %23 : vector<1x128xf32> to vector<128xf32>
    %25 = vector.shape_cast %24 : vector<128xf32> to vector<1x128xf32>
    %26 = vector.broadcast %25 : vector<1x128xf32> to vector<64x128xf32>
    %27 = arith.mulf %22, %26 : vector<64x128xf32>
    %28 = arith.addf %18, %27 : vector<64x128xf32>
    %29 = vector.extract_strided_slice %21 {offsets = [6, 0], sizes = [64, 128], strides = [1, 1]} : vector<72x128xf32> to vector<64x128xf32>
    %30 = vector.extract_strided_slice %11 {offsets = [1, 0], sizes = [1, 128], strides = [1, 1]} : vector<4x128xf32> to vector<1x128xf32>
    %31 = vector.shape_cast %30 : vector<1x128xf32> to vector<128xf32>
    %32 = vector.shape_cast %31 : vector<128xf32> to vector<1x128xf32>
    %33 = vector.broadcast %32 : vector<1x128xf32> to vector<64x128xf32>
    %34 = arith.mulf %29, %33 : vector<64x128xf32>
    %35 = arith.addf %28, %34 : vector<64x128xf32>
    %36 = vector.extract_strided_slice %21 {offsets = [7, 0], sizes = [64, 128], strides = [1, 1]} : vector<72x128xf32> to vector<64x128xf32>
    %37 = vector.extract_strided_slice %11 {offsets = [2, 0], sizes = [1, 128], strides = [1, 1]} : vector<4x128xf32> to vector<1x128xf32>
    %38 = vector.shape_cast %37 : vector<1x128xf32> to vector<128xf32>
    %39 = vector.shape_cast %38 : vector<128xf32> to vector<1x128xf32>
    %40 = vector.broadcast %39 : vector<1x128xf32> to vector<64x128xf32>
    %41 = arith.mulf %36, %40 : vector<64x128xf32>
    %42 = arith.addf %35, %41 : vector<64x128xf32>
    %43 = vector.extract_strided_slice %12 {offsets = [56, 0], sizes = [8, 128], strides = [1, 1]} : vector<64x128xf32> to vector<8x128xf32>
    %c0_12 = arith.constant 0 : index
    %c0_13 = arith.constant 0 : index
    %c0_14 = arith.constant 0 : index
    %44 = vector.load %arg8[%c0_12, %c0_13, %c0_14] : memref<2x8x128xf32, #tpu.memory_space<vmem>>, vector<1x8x128xf32>
    %45 = vector.shape_cast %44 : vector<1x8x128xf32> to vector<8x128xf32>
    %46 = vector.shape_cast %43 : vector<8x128xf32> to vector<1x8x128xf32>
    tpu.vector_store %arg8[%c0_12, %c0_13, %c0_14], %46 {strides = array<i32>} : memref<2x8x128xf32, #tpu.memory_space<vmem>>, vector<1x8x128xf32>,
    %47 = arith.mulf %42, %13 : vector<64x128xf32>
    %c0_15 = arith.constant 0 : index
    %c0_16 = arith.constant 0 : index
    %c0_17 = arith.constant 0 : index
    %48 = vector.load %arg7[%c0_15, %c0_16, %c0_17] : memref<2x64x128xf32, #tpu.memory_space<vmem>>, vector<1x64x128xf32>
    %49 = vector.shape_cast %48 : vector<1x64x128xf32> to vector<64x128xf32>
    %50 = vector.shape_cast %47 : vector<64x128xf32> to vector<1x64x128xf32>
    tpu.vector_store %arg7[%c0_15, %c0_16, %c0_17], %50 {strides = array<i32>} : memref<2x64x128xf32, #tpu.memory_space<vmem>>, vector<1x64x128xf32>,
    %51 = vector.extract_strided_slice %10 {offsets = [64, 0], sizes = [64, 128], strides = [1, 1]} : vector<128x256xf32> to vector<64x128xf32>
    %52 = vector.extract_strided_slice %10 {offsets = [64, 128], sizes = [64, 128], strides = [1, 1]} : vector<128x256xf32> to vector<64x128xf32>
    %53 = vector.extract_strided_slice %11 {offsets = [3, 0], sizes = [1, 128], strides = [1, 1]} : vector<4x128xf32> to vector<1x128xf32>
    %54 = vector.shape_cast %53 : vector<1x128xf32> to vector<128xf32>
    %55 = vector.shape_cast %54 : vector<128xf32> to vector<1x128xf32>
    %56 = vector.broadcast %55 : vector<1x128xf32> to vector<64x128xf32>
    %57 = arith.mulf %51, %56 : vector<64x128xf32>
    %c1 = arith.constant 1 : index
    %c0_18 = arith.constant 0 : index
    %c0_19 = arith.constant 0 : index
    %58 = vector.load %arg8[%c1, %c0_18, %c0_19] : memref<2x8x128xf32, #tpu.memory_space<vmem>>, vector<1x8x128xf32>
    %59 = vector.shape_cast %58 : vector<1x8x128xf32> to vector<8x128xf32>
    %60 = tpu.concatenate %59, %51 in 0 : vector<8x128xf32>, vector<64x128xf32> -> vector<72x128xf32>
    %61 = vector.extract_strided_slice %60 {offsets = [5, 0], sizes = [64, 128], strides = [1, 1]} : vector<72x128xf32> to vector<64x128xf32>
    %62 = vector.extract_strided_slice %11 {offsets = [0, 0], sizes = [1, 128], strides = [1, 1]} : vector<4x128xf32> to vector<1x128xf32>
    %63 = vector.shape_cast %62 : vector<1x128xf32> to vector<128xf32>
    %64 = vector.shape_cast %63 : vector<128xf32> to vector<1x128xf32>
    %65 = vector.broadcast %64 : vector<1x128xf32> to vector<64x128xf32>
    %66 = arith.mulf %61, %65 : vector<64x128xf32>
    %67 = arith.addf %57, %66 : vector<64x128xf32>
    %68 = vector.extract_strided_slice %60 {offsets = [6, 0], sizes = [64, 128], strides = [1, 1]} : vector<72x128xf32> to vector<64x128xf32>
    %69 = vector.extract_strided_slice %11 {offsets = [1, 0], sizes = [1, 128], strides = [1, 1]} : vector<4x128xf32> to vector<1x128xf32>
    %70 = vector.shape_cast %69 : vector<1x128xf32> to vector<128xf32>
    %71 = vector.shape_cast %70 : vector<128xf32> to vector<1x128xf32>
    %72 = vector.broadcast %71 : vector<1x128xf32> to vector<64x128xf32>
    %73 = arith.mulf %68, %72 : vector<64x128xf32>
    %74 = arith.addf %67, %73 : vector<64x128xf32>
    %75 = vector.extract_strided_slice %60 {offsets = [7, 0], sizes = [64, 128], strides = [1, 1]} : vector<72x128xf32> to vector<64x128xf32>
    %76 = vector.extract_strided_slice %11 {offsets = [2, 0], sizes = [1, 128], strides = [1, 1]} : vector<4x128xf32> to vector<1x128xf32>
    %77 = vector.shape_cast %76 : vector<1x128xf32> to vector<128xf32>
    %78 = vector.shape_cast %77 : vector<128xf32> to vector<1x128xf32>
    %79 = vector.broadcast %78 : vector<1x128xf32> to vector<64x128xf32>
    %80 = arith.mulf %75, %79 : vector<64x128xf32>
    %81 = arith.addf %74, %80 : vector<64x128xf32>
    %82 = vector.extract_strided_slice %51 {offsets = [56, 0], sizes = [8, 128], strides = [1, 1]} : vector<64x128xf32> to vector<8x128xf32>
    %c1_20 = arith.constant 1 : index
    %c0_21 = arith.constant 0 : index
    %c0_22 = arith.constant 0 : index
    %83 = vector.load %arg8[%c1_20, %c0_21, %c0_22] : memref<2x8x128xf32, #tpu.memory_space<vmem>>, vector<1x8x128xf32>
    %84 = vector.shape_cast %83 : vector<1x8x128xf32> to vector<8x128xf32>
    %85 = vector.shape_cast %82 : vector<8x128xf32> to vector<1x8x128xf32>
    tpu.vector_store %arg8[%c1_20, %c0_21, %c0_22], %85 {strides = array<i32>} : memref<2x8x128xf32, #tpu.memory_space<vmem>>, vector<1x8x128xf32>,
    %86 = arith.mulf %81, %52 : vector<64x128xf32>
    %c1_23 = arith.constant 1 : index
    %c0_24 = arith.constant 0 : index
    %c0_25 = arith.constant 0 : index
    %87 = vector.load %arg7[%c1_23, %c0_24, %c0_25] : memref<2x64x128xf32, #tpu.memory_space<vmem>>, vector<1x64x128xf32>
    %88 = vector.shape_cast %87 : vector<1x64x128xf32> to vector<64x128xf32>
    %89 = vector.shape_cast %86 : vector<64x128xf32> to vector<1x64x128xf32>
    tpu.vector_store %arg7[%c1_23, %c0_24, %c0_25], %89 {strides = array<i32>} : memref<2x64x128xf32, #tpu.memory_space<vmem>>, vector<1x64x128xf32>,
    return
  }
  func.func @transform_0(%arg0: i32, %arg1: i32, %arg2: i32) -> (i32, i32, i32) {
    %c0_i32 = arith.constant 0 : i32
    %c0_i32_0 = arith.constant 0 : i32
    return %arg0, %arg2, %c0_i32 : i32, i32, i32
  }
  func.func @transform_1(%arg0: i32, %arg1: i32, %arg2: i32) -> (i32, i32) {
    %c0_i32 = arith.constant 0 : i32
    %c0_i32_0 = arith.constant 0 : i32
    return %c0_i32, %arg1 : i32, i32
  }
  func.func @transform_2(%arg0: i32, %arg1: i32, %arg2: i32) -> (i32, i32) {
    %c0_i32 = arith.constant 0 : i32
    %c0_i32_0 = arith.constant 0 : i32
    return %c0_i32, %arg1 : i32, i32
  }
  func.func @transform_3(%arg0: i32, %arg1: i32, %arg2: i32) -> (i32, i32) {
    %c0_i32 = arith.constant 0 : i32
    %c0_i32_0 = arith.constant 0 : i32
    return %c0_i32, %arg1 : i32, i32
  }
  func.func @transform_4(%arg0: i32, %arg1: i32, %arg2: i32) -> (i32, i32, i32) {
    %c0_i32 = arith.constant 0 : i32
    return %arg0, %arg2, %arg1 : i32, i32, i32
  }
}

</mosaic_0001>

<bundles_post_ra>
// kernel: tpu_custom_call.1
= control target key start
LH: loop header
LB: loop body
LE: loop exit
PB: predicated region body
PF: predicated region fallthrough
CT: control target
= control target key end

     0   :  { %9 = vsyncpa [#allocation4], 0  ;;  %s1237_s0 = inlined_call_operand.hbm [shape: f32[2,64,128], index: 0, kind: input, shape index: {}]   ;;  %s1238_s1 = inlined_call_operand.hbm [shape: bf16[128,256], index: 1, kind: input, shape index: {}]   ;;  %s1239_s2 = inlined_call_operand.hbm [shape: f32[1,256], index: 2, kind: input, shape index: {}]   ;;  %s1240_s3 = inlined_call_operand.hbm [shape: f32[4,128], index: 3, kind: input, shape index: {}]   ;;  %s1241_s4 = inlined_call_operand.hbm [shape: f32[2,64,128], index: 4, kind: output, shape index: {}]  }
   0x1   :  { %10 = vsyncpa [#allocation7], 0 }
   0x2   :  { %11 = vsyncpa [#allocation10], 0 }
   0x3   :  { %12 = vsyncpa [#allocation5], 0  ;;  %s30_s17 = sshll.u32 %s1238_s1, 4  ;;  %s927_s18 = smov [#allocation6]   ;;  %s31_s17 = int_to_ptr.hbm [resolvable:$true] %s30_s17 }
   0x4   :  { %s32_s19 = sshll.u32 %s927_s18, 4  ;;  %s17_s22 = sshll.u32 %s1237_s0, 4  ;;  %s33_s19 = int_to_ptr.vmem [resolvable:$true] %s32_s19  ;;  %s18_s22 = int_to_ptr.hbm [resolvable:$true] %s17_s22 }
   0x5   :  { %s928_s23 = smov 128   ;;  %s929_s24 = smov 8  }
   0x6   :  { %38 = dma.hbm_to_vmem [thread:$0]  %s31_s17, 2048, %s33_s19, [#allocation7], %s928_s23, %s928_s23, %s929_s24  }
   0x7   :  { %s930_s25 = smov [#allocation3]   ;;  %s44_s1 = sshll.u32 %s1239_s2, 4  ;;  %s45_s1 = int_to_ptr.hbm [resolvable:$true] %s44_s1 }
   0x8   :  { %s19_s26 = sshll.u32 %s930_s25, 4  ;;  %s55_s30 = sshll.u32 %s1240_s3, 4  ;;  %s20_s26 = int_to_ptr.vmem [resolvable:$true] %s19_s26  ;;  %s56_s30 = int_to_ptr.hbm [resolvable:$true] %s55_s30 }
   0x9   :  { %25 = dma.hbm_to_vmem [thread:$0]  %s18_s22, 2048, %s20_s26, [#allocation4], %s928_s23, %s928_s23, %s929_s24  }
   0xa   :  { %s931_s5 = smov [#allocation8]   ;;  %s932_s7 = smov [#allocation9]  }
   0xb   :  { %s46_s6 = sshll.u32 %s931_s5, 4  ;;  %s57_s8 = sshll.u32 %s932_s7, 4  ;;  %s47_s6 = int_to_ptr.vmem [resolvable:$true] %s46_s6  ;;  %s58_s8 = int_to_ptr.vmem [resolvable:$true] %s57_s8 }
   0xc   :  { %49 = dma.hbm_to_vmem [thread:$0]  %s45_s1, 32, %s47_s6, [#allocation7]  }
   0xd   :  { %60 = dma.hbm_to_vmem [thread:$0]  %s56_s30, 64, %s58_s8, [#allocation10]  }
   0xe   :  { %919 = dma.done.wait [#allocation4], 2048  }
   0xf   :  { %920 = vsyncadd [#allocation4], 4294965248 }
  0x10   :  { %921 = dma.done.wait [#allocation7], 2080  }
  0x11   :  { %922 = vsyncadd [#allocation7], 4294965216 }
  0x12   :  { %923 = dma.done.wait [#allocation10], 64  }
  0x13   :  { %924 = vsyncadd [#allocation10], 4294967232  ;;  %v754_v0 = vld [vmem:[#allocation6 + $0x70] sm:$0xf]  ;;  %v775_v1 = vld [vmem:[#allocation6 + $0x74] sm:$0xf0] }
  0x14   :  { %v774_v2 = vld [vmem:[#allocation6 + $0x74] sm:$0xf]  ;;  %v755_v3 = vor.u32 %v775_v1, %v754_v0  ;;  %v756_v4 = vld [vmem:[#allocation6 + $0x78] sm:$0xf0]  ;;  %v746_v5 = vld [vmem:[#allocation6 + $0x60] sm:$0xf] }
  0x15   :  { %v773_v6 = vld [vmem:[#allocation6 + $0x64] sm:$0xf0]  ;;  %v759_v7 = vor.u32 %v774_v2, %v756_v4  ;;  %v772_v8 = vld [vmem:[#allocation6 + $0x64] sm:$0xf]  ;;  %v748_v9 = vld [vmem:[#allocation6 + $0x68] sm:$0xf0] }
  0x16   :  { %209 = vmatpush.bf16.msra.mxu0 %v755_v3  ;;  %776 = vmatpush.bf16.msra.mxu2 %v755_v3  ;;  %v747_v10 = vor.u32 %v773_v6, %v746_v5  ;;  %v751_v11 = vor.u32 %v772_v8, %v748_v9  ;;  %v738_v12 = vld [vmem:[#allocation6 + $0x50] sm:$0xf]  ;;  %v771_v13 = vld [vmem:[#allocation6 + $0x54] sm:$0xf0]  ;;  %v770_v14 = vld [vmem:[#allocation6 + $0x54] sm:$0xf] }
  0x17   :  { %784 = vmatpush.bf16.msra.mxu3 %v759_v7  ;;  %258 = vmatpush.bf16.msra.mxu1 %v759_v7  ;;  %v740_v15 = vld [vmem:[#allocation6 + $0x58] sm:$0xf0]  ;;  %v739_v16 = vor.u32 %v771_v13, %v738_v12  ;;  %v730_v18 = vld [vmem:[#allocation6 + $0x40] sm:$0xf]  ;;  %v769_v19 = vld [vmem:[#allocation6 + $0x44] sm:$0xf0] }
  0x18   :  { %v743_v17 = vor.u32 %v770_v14, %v740_v15  ;;  %v768_v20 = vld [vmem:[#allocation6 + $0x44] sm:$0xf]  ;;  %v732_v21 = vld [vmem:[#allocation6 + $0x48] sm:$0xf0]  ;;  %v731_v22 = vor.u32 %v769_v19, %v730_v18  ;;  %v722_v24 = vld [vmem:[#allocation6 + $0x30] sm:$0xf] }
  0x19   :  { %v735_v23 = vor.u32 %v768_v20, %v732_v21  ;;  %v767_v25 = vld [vmem:[#allocation6 + $0x34] sm:$0xf0]  ;;  %v766_v26 = vld [vmem:[#allocation6 + $0x34] sm:$0xf]  ;;  %v724_v27 = vld [vmem:[#allocation6 + $0x38] sm:$0xf0] }
  0x1a   :  { %210 = vmatpush.bf16.msra.mxu0 %v747_v10  ;;  %777 = vmatpush.bf16.msra.mxu2 %v747_v10  ;;  %v723_v28 = vor.u32 %v767_v25, %v722_v24  ;;  %v727_v29 = vor.u32 %v766_v26, %v724_v27  ;;  %v714_v30 = vld [vmem:[#allocation6 + $0x20] sm:$0xf]  ;;  %v765_v31 = vld [vmem:[#allocation6 + $0x24] sm:$0xf0]  ;;  %v764_v32 = vld [vmem:[#allocation6 + $0x24] sm:$0xf] }
  0x1b   :  { %785 = vmatpush.bf16.msra.mxu3 %v751_v11  ;;  %259 = vmatpush.bf16.msra.mxu1 %v751_v11  ;;  %v716_v33 = vld [vmem:[#allocation6 + $0x28] sm:$0xf0]  ;;  %v715_v34 = vor.u32 %v765_v31, %v714_v30  ;;  %v706_v36 = vld [vmem:[#allocation6 + $0x10] sm:$0xf]  ;;  %v763_v37 = vld [vmem:[#allocation6 + $0x14] sm:$0xf0] }
  0x1c   :  { %v719_v35 = vor.u32 %v764_v32, %v716_v33  ;;  %v762_v38 = vld [vmem:[#allocation6 + $0x14] sm:$0xf]  ;;  %v708_v39 = vld [vmem:[#allocation6 + $0x18] sm:$0xf0]  ;;  %v707_v40 = vor.u32 %v763_v37, %v706_v36  ;;  %v698_v42 = vld [vmem:[#allocation6] sm:$0xf] }
  0x1d   :  { %v711_v41 = vor.u32 %v762_v38, %v708_v39  ;;  %v761_v43 = vld [vmem:[#allocation6 + $0x4] sm:$0xf0]  ;;  %v760_v44 = vld [vmem:[#allocation6 + $0x4] sm:$0xf]  ;;  %v700_v45 = vld [vmem:[#allocation6 + $0x8] sm:$0xf0] }
  0x1e   :  { %211 = vmatpush.bf16.msra.mxu0 %v739_v16  ;;  %778 = vmatpush.bf16.msra.mxu2 %v739_v16  ;;  %v83_v46 = vld [vmem:[#allocation3] sm:$0xff]  ;;  %v699_v47 = vor.u32 %v761_v43, %v698_v42  ;;  %v84_v48 = vld [vmem:[#allocation3 + $0x8] sm:$0xff]  ;;  %v703_v51 = vor.u32 %v760_v44, %v700_v45  ;;  %v85_v54 = vld [vmem:[#allocation3 + $0x10] sm:$0xff]  ;;  %vm337_vm0 = vcmask 1042432   ;;  %vm390_vm1 = vcmask 1041408   ;;  %s933_s2 = smov [#allocation11]  }
  0x1f   :  { %786 = vmatpush.bf16.msra.mxu3 %v743_v17  ;;  %260 = vmatpush.bf16.msra.mxu1 %v743_v17  ;;  %v91_v49 = vld [vmem:[#allocation3 + $0x40] sm:$0xff]  ;;  %v92_v50 = vld [vmem:[#allocation3 + $0x48] sm:$0xff]  ;;  %v99_v52 = vpack.c.bf16 %v84_v48, %v83_v46  ;;  %v86_v55 = vld [vmem:[#allocation3 + $0x18] sm:$0xff]  ;;  %vm443_vm2 = vcmask 1040384   ;;  %s679_s3 = sshll.u32 %s933_s2, 4  ;;  %s681_s11 = sshll.u32 %s1241_s4, 4  ;;  %s680_s3 = int_to_ptr.vmem [resolvable:$true] %s679_s3  ;;  %s682_s11 = int_to_ptr.hbm [resolvable:$true] %s681_s11 }
  0x20   :  { %v103_v53 = vpack.c.bf16 %v92_v50, %v91_v49  ;;  %v93_v56 = vld [vmem:[#allocation3 + $0x50] sm:$0xff]  ;;  %v94_v57 = vld [vmem:[#allocation3 + $0x58] sm:$0xff]  ;;  %v100_v58 = vpack.c.bf16 %v86_v55, %v85_v54  ;;  %v87_v60 = vld [vmem:[#allocation3 + $0x20] sm:$0xff] }
  0x21   :  { %v104_v59 = vpack.c.bf16 %v94_v57, %v93_v56  ;;  %v88_v61 = vld [vmem:[#allocation3 + $0x28] sm:$0xff]  ;;  %v95_v62 = vld [vmem:[#allocation3 + $0x60] sm:$0xff]  ;;  %v89_v2 = vld [vmem:[#allocation3 + $0x30] sm:$0xff] }
  0x22   :  { %212 = vmatpush.bf16.msra.mxu0 %v731_v22  ;;  %779 = vmatpush.bf16.msra.mxu2 %v731_v22  ;;  %v96_v63 = vld [vmem:[#allocation3 + $0x68] sm:$0xff]  ;;  %v101_v0 = vpack.c.bf16 %v88_v61, %v87_v60  ;;  %v90_v3 = vld [vmem:[#allocation3 + $0x38] sm:$0xff]  ;;  %v97_v4 = vld [vmem:[#allocation3 + $0x70] sm:$0xff] }
  0x23   :  { %787 = vmatpush.bf16.msra.mxu3 %v735_v23  ;;  %261 = vmatpush.bf16.msra.mxu1 %v735_v23  ;;  %v105_v1 = vpack.c.bf16 %v96_v63, %v95_v62  ;;  %v98_v5 = vld [vmem:[#allocation3 + $0x78] sm:$0xff]  ;;  %v102_v6 = vpack.c.bf16 %v90_v3, %v89_v2  ;;  %v307_v8 = vld [vmem:[#allocation9] sm:$0xf]  ;;  %v123_v9 = vld [vmem:[#allocation8] sm:$0x3] }
  0x24   :  { %v106_v7 = vpack.c.bf16 %v98_v5, %v97_v4  ;;  %v977_v10 = vperm.slane %v307_v8, 0  ;;  %v979_v11 = vperm.slane %v307_v8, 1  ;;  %v981_v12 = vperm.slane %v123_v9, 0 }
  0x25   :  { %v983_v13 = vperm.slane %v307_v8, 2  ;;  %v987_v17 = vperm.slane %v307_v8, 3  ;;  %v1001_v31 = vperm.slane %v123_v9, 1 }
  0x26   :  { %213 = vmatpush.bf16.msra.mxu0 %v723_v28  ;;  %780 = vmatpush.bf16.msra.mxu2 %v723_v28  ;;  %v319_v14 = vmul.f32 0.0, %v977_v10  ;;  %v372_v15 = vmul.f32 0.0, %v979_v11 }
  0x27   :  { %788 = vmatpush.bf16.msra.mxu3 %v727_v29  ;;  %262 = vmatpush.bf16.msra.mxu1 %v727_v29  ;;  %v425_v21 = vmul.f32 0.0, %v983_v13 }
  0x28   :  { %v338_v20 = vrot.slane %v319_v14, 5  ;;  %v391_v25 = vrot.slane %v372_v15, 6 }
  0x29   :  { %v444_v32 = vrot.slane %v425_v21, 7 }
  0x2a   :  { %214 = vmatpush.bf16.msra.mxu0 %v715_v34  ;;  %781 = vmatpush.bf16.msra.mxu2 %v715_v34 }
  0x2b   :  { %789 = vmatpush.bf16.msra.mxu3 %v719_v35  ;;  %263 = vmatpush.bf16.msra.mxu1 %v719_v35 }
  0x2e   :  { %215 = vmatpush.bf16.msra.mxu0 %v707_v40  ;;  %782 = vmatpush.bf16.msra.mxu2 %v707_v40 }
  0x2f   :  { %790 = vmatpush.bf16.msra.mxu3 %v711_v41  ;;  %264 = vmatpush.bf16.msra.mxu1 %v711_v41 }
  0x32   :  { %216 = vmatpush.bf16.msra.mxu0 %v699_v47  ;;  %783 = vmatpush.bf16.msra.mxu2 %v699_v47 }
  0x33   :  { %791 = vmatpush.bf16.msra.mxu3 %v703_v51  ;;  %265 = vmatpush.bf16.msra.mxu1 %v703_v51 }
  0x35   :  { %217 = vmatmul.bf16.vlgmr.msra.gmra.mxu0 %v99_v52  ;;  %237 = vmatmul.bf16.vlgmr.msra.gmra.mxu2 %v103_v53 }
  0x36   :  { %286 = vmatmul.bf16.vlgmr.msra.gmra.mxu3 %v103_v53  ;;  %266 = vmatmul.bf16.vlgmr.msra.gmra.mxu1 %v99_v52 }
  0x45   :  { %222 = vmatmul.bf16.gmra.mxu0 %v100_v58  ;;  %242 = vmatmul.bf16.gmra.mxu2 %v104_v59 }
  0x46   :  { %291 = vmatmul.bf16.gmra.mxu3 %v104_v59  ;;  %271 = vmatmul.bf16.gmra.mxu1 %v100_v58 }
  0x55   :  { %227 = vmatmul.bf16.gmra.mxu0 %v101_v0  ;;  %247 = vmatmul.bf16.gmra.mxu2 %v105_v1 }
  0x56   :  { %296 = vmatmul.bf16.gmra.mxu3 %v105_v1  ;;  %276 = vmatmul.bf16.gmra.mxu1 %v101_v0 }
  0x65   :  { %232 = vmatmul.bf16.gmra.mxu0 %v102_v6  ;;  %252 = vmatmul.bf16.gmra.mxu2 %v106_v7 }
  0x66   :  { %301 = vmatmul.bf16.gmra.mxu3 %v106_v7  ;;  %281 = vmatmul.bf16.gmra.mxu1 %v102_v6 }
  0xb2   :  { %v218_v16 = vpop.f32.mrf.mxu0 }
  0xb3   :  { %v219_v18 = vadd.f32 %v218_v16, %v981_v12  ;;  %v267_v19 = vpop.f32.mrf.mxu1 }
  0xb4   :  { %v268_v48 = vadd.f32 %v267_v19, %v1001_v31 }
  0xb5   :  { %v320_v22 = vmul.f32 %v977_v10, %v219_v18  ;;  %v993_v23 = vmul.f32 %v979_v11, %v219_v18  ;;  %v996_v24 = vmul.f32 %v983_v13, %v219_v18  ;;  %v309_v26 = vmul.f32 %v987_v17, %v219_v18 }
  0xb7   :  { %v339_v27 = vrot.slane %v320_v22, 5  ;;  %v392_v28 = vrot.slane %v993_v23, 6  ;;  %v445_v29 = vrot.slane %v996_v24, 7 }
  0xb8   :  { %v238_v30 = vpop.f32.mrf.mxu2 }
  0xb9   :  { %v239_v33 = vadd.f32 %v238_v30, %v981_v12  ;;  %v340_v34 = vsel %vm337_vm0, %v338_v20, %v339_v27  ;;  %v393_v35 = vsel %vm390_vm1, %v391_v25, %v392_v28  ;;  %v287_v36 = vpop.f32.mrf.mxu3  ;;  %v446_v45 = vsel %vm443_vm2, %v444_v32, %v445_v29 }
  0xba   :  { %v220_v37 = vpop.f32.mrf.mxu0  ;;  %v363_v38 = vadd.f32 %v340_v34, %v309_v26  ;;  %v288_v1 = vadd.f32 %v287_v36, %v1001_v31 }
  0xbb   :  { %v505_v39 = vmul.f32 %v977_v10, %v239_v33  ;;  %v556_v40 = vmul.f32 %v979_v11, %v239_v33  ;;  %v1009_v41 = vmul.f32 %v983_v13, %v239_v33  ;;  %v269_v42 = vpop.f32.mrf.mxu1  ;;  %v221_v43 = vadd.f32 %v220_v37, %v981_v12 }
  0xbc   :  { %v416_v44 = vadd.f32 %v393_v35, %v363_v38  ;;  %v494_v49 = vmul.f32 %v987_v17, %v239_v33 }
  0xbd   :  { %v523_v46 = vrot.slane %v505_v39, 5  ;;  %v574_v47 = vrot.slane %v556_v40, 6  ;;  %v321_v50 = vmul.f32 %v977_v10, %v221_v43  ;;  %v1019_v51 = vmul.f32 %v979_v11, %v221_v43 }
  0xbe   :  { %v625_v52 = vrot.slane %v1009_v41, 7  ;;  %v469_v53 = vadd.f32 %v446_v45, %v416_v44  ;;  %v1024_v56 = vmul.f32 %v983_v13, %v221_v43  ;;  %v310_v0 = vmul.f32 %v987_v17, %v221_v43 }
  0xbf   :  { %v524_v54 = vsel %vm337_vm0, %v338_v20, %v523_v46  ;;  %v341_v55 = vrot.slane %v321_v50, 5  ;;  %v394_v59 = vrot.slane %v1019_v51, 6  ;;  %v575_v61 = vsel %vm390_vm1, %v391_v25, %v574_v47 }
  0xc0   :  { %v547_v57 = vadd.f32 %v524_v54, %v494_v49  ;;  %v240_v58 = vpop.f32.mrf.mxu2  ;;  %v478_v60 = vmul.f32 %v469_v53, %v268_v48  ;;  %v626_v5 = vsel %vm443_vm2, %v444_v32, %v625_v52  ;;  %v447_v14 = vrot.slane %v1024_v56, 7 }
  0xc1   :  { %v241_v62 = vadd.f32 %v240_v58, %v981_v12  ;;  %v289_v63 = vpop.f32.mrf.mxu3  ;;  %v342_v4 = vsel %vm337_vm0, %v339_v27, %v341_v55  ;;  %v395_v22 = vsel %vm390_vm1, %v392_v28, %v394_v59  ;;  %v270_v32 = vadd.f32 %v269_v42, %v1001_v31 }
  0xc2   :  { %v598_v2 = vadd.f32 %v575_v61, %v547_v57  ;;  %v223_v3 = vpop.f32.mrf.mxu0  ;;  %486 = vst [vmem:[#allocation11] sm:$0xff] %v478_v60  ;;  %v364_v18 = vadd.f32 %v342_v4, %v310_v0  ;;  %v448_v36 = vsel %vm443_vm2, %v445_v29, %v447_v14  ;;  %v290_v44 = vadd.f32 %v289_v63, %v1001_v31 }
  0xc3   :  { %v506_v6 = vmul.f32 %v977_v10, %v241_v62  ;;  %v1035_v7 = vmul.f32 %v979_v11, %v241_v62  ;;  %v1038_v8 = vmul.f32 %v983_v13, %v241_v62  ;;  %v272_v9 = vpop.f32.mrf.mxu1  ;;  %v224_v16 = vadd.f32 %v223_v3, %v981_v12 }
  0xc4   :  { %v649_v15 = vadd.f32 %v626_v5, %v598_v2  ;;  %v495_v19 = vmul.f32 %v987_v17, %v241_v62  ;;  %v417_v33 = vadd.f32 %v395_v22, %v364_v18 }
  0xc5   :  { %v525_v20 = vrot.slane %v506_v6, 5  ;;  %v576_v21 = vrot.slane %v1035_v7, 6  ;;  %v627_v25 = vrot.slane %v1038_v8, 7  ;;  %v322_v26 = vmul.f32 %v977_v10, %v224_v16 }
  0xc6   :  { %v658_v23 = vmul.f32 %v649_v15, %v288_v1  ;;  %v1048_v27 = vmul.f32 %v979_v11, %v224_v16  ;;  %v1051_v30 = vmul.f32 %v983_v13, %v224_v16  ;;  %v311_v35 = vmul.f32 %v987_v17, %v224_v16 }
  0xc7   :  { %v526_v34 = vsel %vm337_vm0, %v523_v46, %v525_v20  ;;  %v343_v28 = vrot.slane %v322_v26, 5  ;;  %v470_v40 = vadd.f32 %v448_v36, %v417_v33  ;;  %v577_v41 = vsel %vm390_vm1, %v574_v47, %v576_v21 }
  0xc8   :  { %667 = vst [vmem:[#allocation11 + $0x40] sm:$0xff] %v658_v23  ;;  %v548_v37 = vadd.f32 %v526_v34, %v495_v19  ;;  %v243_v38 = vpop.f32.mrf.mxu2  ;;  %v396_v39 = vrot.slane %v1048_v27, 6  ;;  %v628_v46 = vsel %vm443_vm2, %v625_v52, %v627_v25  ;;  %v449_v29 = vrot.slane %v1051_v30, 7 }
  0xc9   :  { %v244_v42 = vadd.f32 %v243_v38, %v981_v12  ;;  %v292_v43 = vpop.f32.mrf.mxu3  ;;  %v344_v24 = vsel %vm337_vm0, %v341_v55, %v343_v28  ;;  %v479_v49 = vmul.f32 %v470_v40, %v270_v32  ;;  %v273_v55 = vadd.f32 %v272_v9, %v1001_v31 }
  0xca   :  { %v599_v45 = vadd.f32 %v577_v41, %v548_v37  ;;  %v225_v48 = vpop.f32.mrf.mxu0  ;;  %v365_v56 = vadd.f32 %v344_v24, %v311_v35  ;;  %v397_v58 = vsel %vm390_vm1, %v394_v59, %v396_v39  ;;  %v450_v59 = vsel %vm443_vm2, %v447_v14, %v449_v29 }
  0xcb   :  { %v507_v50 = vmul.f32 %v977_v10, %v244_v42  ;;  %v1068_v51 = vmul.f32 %v979_v11, %v244_v42  ;;  %v1071_v53 = vmul.f32 %v983_v13, %v244_v42  ;;  %v226_v54 = vadd.f32 %v225_v48, %v981_v12  ;;  %487 = vst [vmem:[#allocation11 + $0x8] sm:$0xff] %v479_v49  ;;  %v274_v60 = vpop.f32.mrf.mxu1 }
  0xcc   :  { %v650_v47 = vadd.f32 %v628_v46, %v599_v45  ;;  %v496_v62 = vmul.f32 %v987_v17, %v244_v42  ;;  %v418_v3 = vadd.f32 %v397_v58, %v365_v56  ;;  %v293_v6 = vadd.f32 %v292_v43, %v1001_v31 }
  0xcd   :  { %v527_v52 = vrot.slane %v507_v50, 5  ;;  %v578_v57 = vrot.slane %v1068_v51, 6  ;;  %v629_v63 = vrot.slane %v1071_v53, 7  ;;  %v323_v0 = vmul.f32 %v977_v10, %v226_v54 }
  0xce   :  { %v659_v61 = vmul.f32 %v650_v47, %v290_v44  ;;  %v1083_v1 = vmul.f32 %v979_v11, %v226_v54  ;;  %v1086_v2 = vmul.f32 %v983_v13, %v226_v54  ;;  %v312_v9 = vmul.f32 %v987_v17, %v226_v54 }
  0xcf   :  { %v528_v4 = vsel %vm337_vm0, %v525_v20, %v527_v52  ;;  %v345_v5 = vrot.slane %v323_v0, 5  ;;  %v471_v15 = vadd.f32 %v450_v59, %v418_v3  ;;  %v579_v16 = vsel %vm390_vm1, %v576_v21, %v578_v57 }
  0xd0   :  { %668 = vst [vmem:[#allocation11 + $0x48] sm:$0xff] %v659_v61  ;;  %v549_v7 = vadd.f32 %v528_v4, %v496_v62  ;;  %v245_v8 = vpop.f32.mrf.mxu2  ;;  %v398_v20 = vrot.slane %v1083_v1, 6  ;;  %v630_v23 = vsel %vm443_vm2, %v627_v25, %v629_v63  ;;  %v451_v32 = vrot.slane %v1086_v2, 7 }
  0xd1   :  { %v246_v18 = vadd.f32 %v245_v8, %v981_v12  ;;  %v294_v19 = vpop.f32.mrf.mxu3  ;;  %v346_v14 = vsel %vm337_vm0, %v343_v28, %v345_v5  ;;  %v480_v33 = vmul.f32 %v471_v15, %v273_v55  ;;  %v275_v41 = vadd.f32 %v274_v60, %v1001_v31 }
  0xd2   :  { %v600_v22 = vadd.f32 %v579_v16, %v549_v7  ;;  %v228_v26 = vpop.f32.mrf.mxu0  ;;  %v366_v38 = vadd.f32 %v346_v14, %v312_v9  ;;  %v399_v45 = vsel %vm390_vm1, %v396_v39, %v398_v20  ;;  %v452_v27 = vsel %vm443_vm2, %v449_v29, %v451_v32 }
  0xd3   :  { %v508_v34 = vmul.f32 %v977_v10, %v246_v18  ;;  %v1102_v35 = vmul.f32 %v979_v11, %v246_v18  ;;  %v1105_v36 = vmul.f32 %v983_v13, %v246_v18  ;;  %v229_v37 = vadd.f32 %v228_v26, %v981_v12  ;;  %488 = vst [vmem:[#allocation11 + $0x10] sm:$0xff] %v480_v33  ;;  %v277_v50 = vpop.f32.mrf.mxu1 }
  0xd4   :  { %v651_v21 = vadd.f32 %v630_v23, %v600_v22  ;;  %v497_v25 = vmul.f32 %v987_v17, %v246_v18  ;;  %v419_v24 = vadd.f32 %v399_v45, %v366_v38  ;;  %v295_v56 = vadd.f32 %v294_v19, %v1001_v31 }
  0xd5   :  { %v529_v40 = vrot.slane %v508_v34, 5  ;;  %v580_v28 = vrot.slane %v1102_v35, 6  ;;  %v631_v43 = vrot.slane %v1105_v36, 7  ;;  %v324_v44 = vmul.f32 %v977_v10, %v229_v37 }
  0xd6   :  { %v660_v42 = vmul.f32 %v651_v21, %v293_v6  ;;  %v1117_v46 = vmul.f32 %v979_v11, %v229_v37  ;;  %v1120_v48 = vmul.f32 %v983_v13, %v229_v37  ;;  %v313_v51 = vmul.f32 %v987_v17, %v229_v37 }
  0xd7   :  { %v530_v49 = vsel %vm337_vm0, %v527_v52, %v529_v40  ;;  %v347_v47 = vrot.slane %v324_v44, 5  ;;  %v472_v54 = vadd.f32 %v452_v27, %v419_v24  ;;  %v581_v55 = vsel %vm390_vm1, %v578_v57, %v580_v28 }
  0xd8   :  { %669 = vst [vmem:[#allocation11 + $0x50] sm:$0xff] %v660_v42  ;;  %v550_v53 = vadd.f32 %v530_v49, %v497_v25  ;;  %v248_v39 = vpop.f32.mrf.mxu2  ;;  %v400_v52 = vrot.slane %v1117_v46, 6  ;;  %v632_v61 = vsel %vm443_vm2, %v629_v63, %v631_v43  ;;  %v453_v30 = vrot.slane %v1120_v48, 7 }
  0xd9   :  { %v249_v58 = vadd.f32 %v248_v39, %v981_v12  ;;  %v348_v0 = vsel %vm337_vm0, %v345_v5, %v347_v47  ;;  %v481_v29 = vmul.f32 %v472_v54, %v275_v41  ;;  %v297_v3 = vpop.f32.mrf.mxu3  ;;  %v278_v8 = vadd.f32 %v277_v50, %v1001_v31 }
  0xda   :  { %v601_v60 = vadd.f32 %v581_v55, %v550_v53  ;;  %v230_v62 = vpop.f32.mrf.mxu0  ;;  %v367_v6 = vadd.f32 %v348_v0, %v313_v51  ;;  %v401_v18 = vsel %vm390_vm1, %v398_v20, %v400_v52  ;;  %v454_v33 = vsel %vm443_vm2, %v451_v32, %v453_v30 }
  0xdb   :  { %v509_v1 = vmul.f32 %v977_v10, %v249_v58  ;;  %v1136_v2 = vmul.f32 %v979_v11, %v249_v58  ;;  %v1139_v4 = vmul.f32 %v983_v13, %v249_v58  ;;  %v231_v59 = vadd.f32 %v230_v62, %v981_v12  ;;  %489 = vst [vmem:[#allocation11 + $0x18] sm:$0xff] %v481_v29  ;;  %v279_v25 = vpop.f32.mrf.mxu1 }
  0xdc   :  { %v652_v57 = vadd.f32 %v632_v61, %v601_v60  ;;  %v498_v63 = vmul.f32 %v987_v17, %v249_v58  ;;  %v420_v23 = vadd.f32 %v401_v18, %v367_v6  ;;  %v298_v34 = vadd.f32 %v297_v3, %v1001_v31 }
  0xdd   :  { %v531_v5 = vrot.slane %v509_v1, 5  ;;  %v582_v7 = vrot.slane %v1136_v2, 6  ;;  %v633_v15 = vrot.slane %v1139_v4, 7  ;;  %v325_v16 = vmul.f32 %v977_v10, %v231_v59 }
  0xde   :  { %v661_v9 = vmul.f32 %v652_v57, %v295_v56  ;;  %v1149_v19 = vmul.f32 %v979_v11, %v231_v59  ;;  %v1152_v22 = vmul.f32 %v983_v13, %v231_v59  ;;  %v314_v20 = vmul.f32 %v987_v17, %v231_v59 }
  0xdf   :  { %v532_v26 = vsel %vm337_vm0, %v529_v40, %v531_v5  ;;  %v349_v14 = vrot.slane %v325_v16, 5  ;;  %v473_v36 = vadd.f32 %v454_v33, %v420_v23  ;;  %v583_v37 = vsel %vm390_vm1, %v580_v28, %v582_v7 }
  0xe0   :  { %670 = vst [vmem:[#allocation11 + $0x58] sm:$0xff] %v661_v9  ;;  %v551_v35 = vadd.f32 %v532_v26, %v498_v63  ;;  %v250_v21 = vpop.f32.mrf.mxu2  ;;  %v402_v40 = vrot.slane %v1149_v19, 6  ;;  %v634_v42 = vsel %vm443_vm2, %v631_v43, %v633_v15  ;;  %v455_v45 = vrot.slane %v1152_v22, 7 }
  0xe1   :  { %v251_v38 = vadd.f32 %v250_v21, %v981_v12  ;;  %v350_v32 = vsel %vm337_vm0, %v347_v47, %v349_v14  ;;  %v482_v46 = vmul.f32 %v473_v36, %v278_v8  ;;  %v280_v39 = vadd.f32 %v279_v25, %v1001_v31  ;;  %v299_v54 = vpop.f32.mrf.mxu3 }
  0xe2   :  { %v602_v41 = vadd.f32 %v583_v37, %v551_v35  ;;  %v233_v44 = vpop.f32.mrf.mxu0  ;;  %v368_v27 = vadd.f32 %v350_v32, %v314_v20  ;;  %v403_v60 = vsel %vm390_vm1, %v400_v52, %v402_v40  ;;  %v456_v3 = vsel %vm443_vm2, %v453_v30, %v455_v45 }
  0xe3   :  { %v510_v24 = vmul.f32 %v977_v10, %v251_v38  ;;  %v1168_v49 = vmul.f32 %v979_v11, %v251_v38  ;;  %v1171_v50 = vmul.f32 %v983_v13, %v251_v38  ;;  %v234_v51 = vadd.f32 %v233_v44, %v981_v12  ;;  %490 = vst [vmem:[#allocation11 + $0x20] sm:$0xff] %v482_v46  ;;  %v282_v26 = vpop.f32.mrf.mxu1 }
  0xe4   :  { %v653_v28 = vadd.f32 %v634_v42, %v602_v41  ;;  %v499_v43 = vmul.f32 %v987_v17, %v251_v38  ;;  %v421_v0 = vadd.f32 %v403_v60, %v368_v27  ;;  %v300_v59 = vadd.f32 %v299_v54, %v1001_v31 }
  0xe5   :  { %v533_v53 = vrot.slane %v510_v24, 5  ;;  %v584_v47 = vrot.slane %v1168_v49, 6  ;;  %v635_v55 = vrot.slane %v1171_v50, 7  ;;  %v326_v58 = vmul.f32 %v977_v10, %v234_v51 }
  0xe6   :  { %v662_v56 = vmul.f32 %v653_v28, %v298_v34  ;;  %v1181_v61 = vmul.f32 %v979_v11, %v234_v51  ;;  %v1184_v62 = vmul.f32 %v983_v13, %v234_v51  ;;  %v315_v1 = vmul.f32 %v987_v17, %v234_v51 }
  0xe7   :  { %v534_v29 = vsel %vm337_vm0, %v531_v5, %v533_v53  ;;  %v351_v2 = vrot.slane %v326_v58, 5  ;;  %v474_v4 = vadd.f32 %v456_v3, %v421_v0  ;;  %v585_v6 = vsel %vm390_vm1, %v582_v7, %v584_v47 }
  0xe8   :  { %671 = vst [vmem:[#allocation11 + $0x60] sm:$0xff] %v662_v56  ;;  %v552_v52 = vadd.f32 %v534_v29, %v499_v43  ;;  %v253_v57 = vpop.f32.mrf.mxu2  ;;  %v404_v5 = vrot.slane %v1181_v61, 6  ;;  %v636_v9 = vsel %vm443_vm2, %v633_v15, %v635_v55  ;;  %v457_v48 = vrot.slane %v1184_v62, 7 }
  0xe9   :  { %v254_v63 = vadd.f32 %v253_v57, %v981_v12  ;;  %v352_v18 = vsel %vm337_vm0, %v349_v14, %v351_v2  ;;  %v483_v30 = vmul.f32 %v474_v4, %v280_v39  ;;  %v283_v14 = vadd.f32 %v282_v26, %v1001_v31  ;;  %v302_v32 = vpop.f32.mrf.mxu3 }
  0xea   :  { %v603_v8 = vadd.f32 %v585_v6, %v552_v52  ;;  %v235_v16 = vpop.f32.mrf.mxu0  ;;  %v369_v35 = vadd.f32 %v352_v18, %v315_v1  ;;  %v405_v25 = vsel %vm390_vm1, %v402_v40, %v404_v5  ;;  %v458_v49 = vsel %vm443_vm2, %v455_v45, %v457_v48 }
  0xeb   :  { %v511_v19 = vmul.f32 %v977_v10, %v254_v63  ;;  %v562_v23 = vmul.f32 %v979_v11, %v254_v63  ;;  %v613_v7 = vmul.f32 %v983_v13, %v254_v63  ;;  %v236_v34 = vadd.f32 %v235_v16, %v981_v12  ;;  %491 = vst [vmem:[#allocation11 + $0x28] sm:$0xff] %v483_v30  ;;  %v284_v1 = vpop.f32.mrf.mxu1 }
  0xec   :  { %v654_v33 = vadd.f32 %v636_v9, %v603_v8  ;;  %v500_v15 = vmul.f32 %v987_v17, %v254_v63  ;;  %v422_v44 = vadd.f32 %v405_v25, %v369_v35  ;;  %v303_v28 = vadd.f32 %v302_v32, %v1001_v31 }
  0xed   :  { %v535_v21 = vrot.slane %v511_v19, 5  ;;  %v586_v20 = vrot.slane %v562_v23, 6  ;;  %v637_v37 = vrot.slane %v613_v7, 7  ;;  %v327_v38 = vmul.f32 %v977_v10, %v236_v34 }
  0xee   :  { %v663_v36 = vmul.f32 %v654_v33, %v300_v59  ;;  %v380_v41 = vmul.f32 %v979_v11, %v236_v34  ;;  %v433_v42 = vmul.f32 %v983_v13, %v236_v34  ;;  %v475_v40 = vadd.f32 %v458_v49, %v422_v44 }
  0xef   :  { %v536_v46 = vsel %vm337_vm0, %v533_v53, %v535_v21  ;;  %v353_v24 = vrot.slane %v327_v38, 5  ;;  %v587_v43 = vsel %vm390_vm1, %v584_v47, %v586_v20  ;;  %v316_v54 = vmul.f32 %v987_v17, %v236_v34 }
  0xf0   :  { %672 = vst [vmem:[#allocation11 + $0x68] sm:$0xff] %v663_v36  ;;  %v553_v50 = vadd.f32 %v536_v46, %v500_v15  ;;  %v255_v51 = vpop.f32.mrf.mxu2  ;;  %v406_v27 = vrot.slane %v380_v41, 6  ;;  %v638_v53 = vsel %vm443_vm2, %v635_v55, %v637_v37  ;;  %v459_v22 = vrot.slane %v433_v42, 7 }
  0xf1   :  { %v256_v39 = vadd.f32 %v255_v51, %v981_v12  ;;  %v354_v58 = vsel %vm337_vm0, %v351_v2, %v353_v24  ;;  %v484_v60 = vmul.f32 %v475_v40, %v283_v14  ;;  %v304_v6 = vpop.f32.mrf.mxu3 }
  0xf2   :  { %v604_v56 = vadd.f32 %v587_v43, %v553_v50  ;;  %v370_v29 = vadd.f32 %v354_v58, %v316_v54  ;;  %v407_v3 = vsel %vm390_vm1, %v404_v5, %v406_v27  ;;  %v460_v4 = vsel %vm443_vm2, %v457_v48, %v459_v22 }
  0xf3   :  { %v512_v45 = vmul.f32 %v977_v10, %v256_v39  ;;  %v563_v61 = vmul.f32 %v979_v11, %v256_v39  ;;  %v614_v0 = vmul.f32 %v983_v13, %v256_v39  ;;  %492 = vst [vmem:[#allocation11 + $0x30] sm:$0xff] %v484_v60  ;;  %v501_v55 = vmul.f32 %v987_v17, %v256_v39 }
  0xf4   :  { %v655_v62 = vadd.f32 %v638_v53, %v604_v56  ;;  %v423_v2 = vadd.f32 %v407_v3, %v370_v29  ;;  %v285_v11 = vadd.f32 %v284_v1, %v1001_v31  ;;  %v305_v17 = vadd.f32 %v304_v6, %v1001_v31 }
  0xf5   :  { %v537_v47 = vrot.slane %v512_v45, 5  ;;  %v588_v12 = vrot.slane %v563_v61, 6  ;;  %v639_v57 = vrot.slane %v614_v0, 7 }
  0xf6   :  { %v664_v52 = vmul.f32 %v655_v62, %v303_v28  ;;  %v476_v13 = vadd.f32 %v460_v4, %v423_v2 }
  0xf7   :  { %v538_v10 = vsel %vm337_vm0, %v535_v21, %v537_v47  ;;  %v589_v63 = vsel %vm390_vm1, %v586_v20, %v588_v12  ;;  %v640_v5 = vsel %vm443_vm2, %v637_v37, %v639_v57 }
  0xf8   :  { %673 = vst [vmem:[#allocation11 + $0x70] sm:$0xff] %v664_v52  ;;  %v554_v59 = vadd.f32 %v538_v10, %v501_v55  ;;  %v485_v8 = vmul.f32 %v476_v13, %v285_v11 }
  0xfa   :  { %v605_v9 = vadd.f32 %v589_v63, %v554_v59  ;;  %493 = vst [vmem:[#allocation11 + $0x38] sm:$0xff] %v485_v8 }
  0xfc   :  { %v656_v16 = vadd.f32 %v640_v5, %v605_v9 }
  0xfe   :  { %v665_v18 = vmul.f32 %v656_v16, %v305_v17 }
 0x100   :  { %674 = vst [vmem:[#allocation11 + $0x78] sm:$0xff] %v665_v18 }
 0x101   :  { %687 = dma.vmem_to_hbm [thread:$0]  %s680_s3, 2048, %s682_s11, [#allocation5], %s928_s23, %s928_s23, %s929_s24  }
 0x102   :  { %925 = dma.done.wait [#allocation5], 2048  }
 0x103   :  { %926 = vsyncadd [#allocation5], 4294965248 }
 0x104   :  { %692 = vsyncpa [#allocation4], 1 }
 0x105   :  { %693 = vsyncpa [#allocation7], 1 }
 0x106   :  { %694 = vsyncpa [#allocation10], 1 }
 0x107   :  { %695 = vsyncpa [#allocation5], 1 }

</bundles_post_ra>
